<compile_context>
chip_gen: v5e
topology: v5e:2x2
jax: 0.10.0
libtpu: 0.0.40
codegen_flags: <defaults>
</compile_context>

<pallas_src>
import math

import jax
import jax.numpy as jnp
from jax.experimental import pallas as pl
from jax.experimental.pallas import tpu as pltpu


# ----------------------------------------------------------------------------
# Pallas kernel: one bf16 matmul (f32 accumulate) + threshold compare.
# ----------------------------------------------------------------------------
def _ttfs_lif_kernel(x_ref, m_ref, thr_ref, v_ref, spike_ref):
    # x_ref:     (Bb, C_in*T)        spike counts, native [C_in, T] row order
    # m_ref:     (C_in*T, T*C_out)   fused decay*weight matrix (bf16)
    # thr_ref:   (1, T*C_out)        per-timestep threshold, repeated over C_out
    # v_ref:     (Bb, T*C_out)       membrane potential (f32, lane-dense)
    # spike_ref: (Bb, T*C_out)       Heaviside(v - thr)   (lane-dense)
    #
    # Cast x in-kernel (cheap VPU convert) instead of adding a wrapper-side
    # cast pass over HBM; if the caller can provide bf16/int8 counts directly
    # the input DMA halves/quarters for free.
    x = x_ref[...].astype(jnp.bfloat16)                              # (Bb, K)
    v = jnp.dot(x, m_ref[...], preferred_element_type=jnp.float32)   # (Bb, N) f32
    v_ref[...] = v
    # surrogate.Sigmoid forward == Heaviside step (sigmoid only in backward).
    spike_ref[...] = (v >= thr_ref[...]).astype(spike_ref.dtype)


# ----------------------------------------------------------------------------
# Wrapper (glue in plain JAX; builds the fused coefficient matrix once)
# ----------------------------------------------------------------------------
def ttfs_lif_forward(count_t, weight, threshold,
                     tau=2.0, tau_s=2.0 / 4, v_threshold=1.0, delta=1,
                     block_b=None):
    """count_t: [B, C_in, T] (PyTorch layout); weight: [C_out, C_in];
    threshold: scalar or [T]. Returns (v_out, spike), each [B, T, C_out]."""
    B, C_in, T = count_t.shape
    C_out = weight.shape[0]
    K = C_in * T           # contraction length
    N = T * C_out          # lane-dense collapsed output width

    # --- constants (identical to the PyTorch module) --------------------------
    t_max = tau * tau_s * math.log(tau / tau_s) / (tau - tau_s)
    v0 = v_threshold / (math.exp(-t_max / tau) - math.exp(-t_max / tau_s))

    # Causal decay matrix D[t, s] = v0*(exp(-(t-s+delta)/tau) - exp(-(t-s+delta)/tau_s)).
    ti = jnp.arange(T)[:, None]
    si = jnp.arange(T)[None, :]
    lag = (ti - si).astype(jnp.float32)
    causal = ti >= si
    d1 = jnp.where(causal, jnp.exp(-(lag + delta) / tau), 0.0)
    d2 = jnp.where(causal, jnp.exp(-(lag + delta) / tau_s), 0.0)
    decay = (v0 * (d1 - d2)).astype(jnp.float32)                     # [T, T]

    # Fused coefficient matrix M[i*T + s, t*C_out + o] = D[t, s] * W[o, i].
    # Built once in f32 then cast to bf16 (MXU-native); f32 accumulation keeps
    # near-threshold behaviour tight.
    wt = weight.astype(jnp.float32).T                                # [C_in, C_out]
    m = wt[:, None, None, :] * decay.T[None, :, :, None]             # [C_in, Ts, Tt, C_out]
    m = m.reshape(K, N).astype(jnp.bfloat16)                         # [K, N]

    # Per-timestep threshold, repeated across C_out -> lane index t*C_out + o.
    thr = jnp.broadcast_to(jnp.asarray(threshold, jnp.float32).reshape(-1), (T,))
    thr_flat = jnp.repeat(thr, C_out).reshape(1, N)                  # [1, N]

    # Input in NATIVE memory order: [B, C_in, T] -> [B, C_in*T] is a free
    # row-major reshape; no XLA-side transpose (it is folded into M above).
    x2 = count_t.reshape(B, K)

    # --- batch blocking (review item: many batch rows per grid step) ----------
    if block_b is None:
        block_b = min(512, B)
    block_b = max(8, ((int(block_b) + 7) // 8) * 8)   # sublane-aligned block
    grid_b = pl.cdiv(B, block_b)
    b_pad = grid_b * block_b
    if b_pad != B:
        x2 = jnp.pad(x2, ((0, b_pad - B), (0, 0)))

    v2, s2 = pl.pallas_call(
        _ttfs_lif_kernel,
        out_shape=(
            jax.ShapeDtypeStruct((b_pad, N), jnp.float32),
            # NOTE: spike is binary; emit bf16/int8 here if the consumer
            # accepts it to halve/quarter the store traffic.
            jax.ShapeDtypeStruct((b_pad, N), jnp.float32),
        ),
        grid_spec=pltpu.PrefetchScalarGridSpec(
            num_scalar_prefetch=0,
            grid=(grid_b,),
            in_specs=[
                pl.BlockSpec((block_b, K), lambda g: (g, 0)),
                pl.BlockSpec((K, N), lambda g: (0, 0)),
                pl.BlockSpec((1, N), lambda g: (0, 0)),
            ],
            out_specs=[
                pl.BlockSpec((block_b, N), lambda g: (g, 0)),
                pl.BlockSpec((block_b, N), lambda g: (g, 0)),
            ],
        ),
        compiler_params=pltpu.CompilerParams(
            dimension_semantics=("parallel",),   # batch blocks shard across TCs (v7x)
        ),
    )(x2, m, thr_flat)

    if b_pad != B:
        v2 = v2[:B]
        s2 = s2[:B]
    # Free row-major reshape back to the module's return layout [B, T, C_out].
    v_out = v2.reshape(B, T, C_out)
    spike = s2.reshape(B, T, C_out)
    return v_out, spike


# ----------------------------------------------------------------------------
# Pure-JAX reference (mirrors the PyTorch loop exactly) for a sanity check
# ----------------------------------------------------------------------------
def _ref_forward(count_t, weight, threshold,
                 tau=2.0, tau_s=2.0 / 4, v_threshold=1.0, delta=1):
    B, C_in, T = count_t.shape
    t_max = tau * tau_s * math.log(tau / tau_s) / (tau - tau_s)
    v0 = v_threshold / (math.exp(-t_max / tau) - math.exp(-t_max / tau_s))
    a1 = math.exp(-delta / tau)
    a2 = math.exp(-delta / tau_s)

    psp1 = a1 * count_t
    psp2 = a2 * count_t
    p1 = [psp1[:, :, 0]]
    p2 = [psp2[:, :, 0]]
    for t in range(1, T):
        p1.append(psp1[:, :, t] + p1[-1] * math.exp(-1.0 / tau))
        p2.append(psp2[:, :, t] + p2[-1] * math.exp(-1.0 / tau_s))
    psp1 = jnp.stack(p1, axis=2)
    psp2 = jnp.stack(p2, axis=2)

    feat = v0 * (psp1 - psp2)                                  # [B, C_in, T]
    v_bt = jnp.einsum("bct,oc->bto", feat, weight,
                      preferred_element_type=jnp.float32)      # [B, T, C_out]
    thr = jnp.asarray(threshold, jnp.float32).reshape(-1)      # [T] (or [1])
    spike = (v_bt - thr[None, :, None] >= 0.0).astype(jnp.float32)
    return v_bt, spike


if __name__ == "__main__":
    B, C_in, C_out, T = 16, 32, 16, 8

    key = jax.random.PRNGKey(0)
    k_x, k_w, k_thr = jax.random.split(key, 3)

    # Deterministic synthetic parameters / inputs.
    count_t = jax.random.randint(k_x, (B, C_in, T), 0, 3).astype(jnp.float32)
    weight = jax.random.normal(k_w, (C_out, C_in), jnp.float32) / math.sqrt(C_in)
    threshold = jax.random.uniform(k_thr, (T,), jnp.float32, 0.2, 0.8)

    # block_b=8 -> grid=(2,), an even, parallel batch-block axis.
    v_out, spike = ttfs_lif_forward(count_t, weight, threshold, block_b=8)
    jax.block_until_ready((v_out, spike))

    v_ref, s_ref = _ref_forward(count_t, weight, threshold)
    assert v_out.shape == (B, T, C_out) and spike.shape == (B, T, C_out)
    # bf16 coefficient matrix + f32 accumulation: small absolute error budget.
    assert jnp.allclose(v_out, v_ref, atol=5e-2, rtol=5e-2), \
        float(jnp.max(jnp.abs(v_out - v_ref)))
    # Spikes are binary; allow a negligible fraction of near-threshold flips.
    assert float(jnp.mean(jnp.abs(spike - s_ref))) <= 0.05

    print("KERNEL_OK")
</pallas_src>

<mosaic_0001>
module attributes {stable_mosaic.version = 11 : i64} {
  func.func @_ttfs_lif_kernel(%arg0: i32, %arg1: memref<8x256xf32, #tpu.memory_space<vmem>>, %arg2: memref<256x128xbf16, #tpu.memory_space<vmem>>, %arg3: memref<1x128xf32, #tpu.memory_space<vmem>>, %arg4: memref<8x128xf32, #tpu.memory_space<vmem>>, %arg5: memref<8x128xf32, #tpu.memory_space<vmem>>) attributes {dimension_semantics = [#tpu.dimension_semantics<parallel>], iteration_bounds = array<i64: 2>, scalar_prefetch = 0 : i64, scratch_operands = 0 : i64, tpu.core_type = #tpu.core_type<tc>, window_params = [{transform_indices = @transform_0, window_bounds = array<i64: 8, 256>}, {pipeline_mode = #tpu.pipeline_mode<synchronous>, transform_indices = @transform_1, window_bounds = array<i64: 256, 128>}, {pipeline_mode = #tpu.pipeline_mode<synchronous>, transform_indices = @transform_2, window_bounds = array<i64: 1, 128>}, {transform_indices = @transform_3, window_bounds = array<i64: 8, 128>}, {transform_indices = @transform_4, window_bounds = array<i64: 8, 128>}]} {
    %c0 = arith.constant 0 : index
    %c0_0 = arith.constant 0 : index
    %0 = vector.load %arg1[%c0, %c0_0] : memref<8x256xf32, #tpu.memory_space<vmem>>, vector<8x256xf32>
    %1 = arith.truncf %0 : vector<8x256xf32> to vector<8x256xbf16>
    %c0_1 = arith.constant 0 : index
    %c0_2 = arith.constant 0 : index
    %2 = vector.load %arg2[%c0_1, %c0_2] : memref<256x128xbf16, #tpu.memory_space<vmem>>, vector<256x128xbf16>
    %cst = arith.constant dense<0.000000e+00> : vector<8x128xf32>
    %3 = tpu.matmul %1, %2, %cst {dimension_numbers = #tpu.dot_dimension_numbers<[1], [0], [0], [1], [0, 0, 1, 1], [], []>} : vector<8x256xbf16>, vector<256x128xbf16>, vector<8x128xf32> -> vector<8x128xf32>
    %c0_3 = arith.constant 0 : index
    %c0_4 = arith.constant 0 : index
    %4 = vector.load %arg4[%c0_3, %c0_4] : memref<8x128xf32, #tpu.memory_space<vmem>>, vector<8x128xf32>
    tpu.vector_store %arg4[%c0_3, %c0_4], %3 {strides = array<i32>} : memref<8x128xf32, #tpu.memory_space<vmem>>, vector<8x128xf32>,
    %c0_5 = arith.constant 0 : index
    %c0_6 = arith.constant 0 : index
    %5 = vector.load %arg3[%c0_5, %c0_6] : memref<1x128xf32, #tpu.memory_space<vmem>>, vector<1x128xf32>
    %6 = vector.broadcast %5 : vector<1x128xf32> to vector<8x128xf32>
    %7 = arith.cmpf oge, %3, %6 : vector<8x128xf32>
    %8 = arith.extui %7 : vector<8x128xi1> to vector<8x128xi32>
    %9 = arith.sitofp %8 : vector<8x128xi32> to vector<8x128xf32>
    %c0_7 = arith.constant 0 : index
    %c0_8 = arith.constant 0 : index
    %10 = vector.load %arg5[%c0_7, %c0_8] : memref<8x128xf32, #tpu.memory_space<vmem>>, vector<8x128xf32>
    tpu.vector_store %arg5[%c0_7, %c0_8], %9 {strides = array<i32>} : memref<8x128xf32, #tpu.memory_space<vmem>>, vector<8x128xf32>,
    return
  }
  func.func @transform_0(%arg0: i32) -> (i32, i32) {
    %c0_i32 = arith.constant 0 : i32
    %c0_i32_0 = arith.constant 0 : i32
    return %arg0, %c0_i32 : i32, i32
  }
  func.func @transform_1(%arg0: i32) -> (i32, i32) {
    %c0_i32 = arith.constant 0 : i32
    %c0_i32_0 = arith.constant 0 : i32
    %c0_i32_1 = arith.constant 0 : i32
    return %c0_i32, %c0_i32_0 : i32, i32
  }
  func.func @transform_2(%arg0: i32) -> (i32, i32) {
    %c0_i32 = arith.constant 0 : i32
    %c0_i32_0 = arith.constant 0 : i32
    %c0_i32_1 = arith.constant 0 : i32
    return %c0_i32, %c0_i32_0 : i32, i32
  }
  func.func @transform_3(%arg0: i32) -> (i32, i32) {
    %c0_i32 = arith.constant 0 : i32
    %c0_i32_0 = arith.constant 0 : i32
    return %arg0, %c0_i32 : i32, i32
  }
  func.func @transform_4(%arg0: i32) -> (i32, i32) {
    %c0_i32 = arith.constant 0 : i32
    %c0_i32_0 = arith.constant 0 : i32
    return %arg0, %c0_i32 : i32, i32
  }
}

</mosaic_0001>

<bundles_post_ra>
// kernel: tpu_custom_call.1
= control target key start
LH: loop header
LB: loop body
LE: loop exit
PB: predicated region body
PF: predicated region fallthrough
CT: control target
= control target key end

     0   :  { %10 = vsyncpa [#allocation3], 0  ;;  %s1083_s0 = inlined_call_operand.hbm [shape: f32[16,256], index: 0, kind: input, shape index: {}]   ;;  %s1084_s1 = inlined_call_operand.hbm [shape: bf16[256,128], index: 1, kind: input, shape index: {}]   ;;  %s1085_s2 = inlined_call_operand.vmem [shape: f32[1,128], index: 2, kind: input, shape index: {}]   ;;  %s1086_s3 = inlined_call_operand.hbm [shape: f32[16,128], index: 3, kind: output, shape index: {0}]   ;;  %s1087_s4 = inlined_call_operand.hbm [shape: f32[16,128], index: 4, kind: output, shape index: {1}]  }
   0x1   :  { %12 = vsyncpa [#allocation3 + $0x1], 0 }
   0x2   :  { %13 = vsyncpa [#allocation6], 0 }
   0x3   :  { %14 = vsyncpa [#allocation4], 0 }
   0x4   :  { %16 = vsyncpa [#allocation4 + $0x1], 0 }
   0x5   :  { %17 = vsyncpa [#allocation9], 0 }
   0x6   :  { %19 = vsyncpa [#allocation9 + $0x1], 0  ;;  %s918_s15 = smov 0   ;;  %s920_s16 = smov 0  }
   0x7   :  { %s922_s17 = smov 0   ;;  %s924_s18 = smov 0  }
   0x8 LB: > { %s161_s21 = sshll.u32 %s1084_s1, 4  ;;  %s942_s22 = sadd.s32 4294967295, %s887_s18   ;;  %s887_s18 = sphi %s924_s18, %s1097_s18   ;;  %s883_s17 = sphi %s922_s17, %s1096_s17   ;;  %s879_s16 = sphi %s920_s16, %s1095_s16   ;;  %s875_s15 = sphi %s918_s15, %s1094_s15   ;;  %s162_s21 = int_to_ptr.hbm [resolvable:$true] %s161_s21 }
   0x9   : > { %p560_p0 = scmp.ge.s32.totalorder %s887_s18, 1  ;;  %p46_p1 = scmp.eq.s32.totalorder %s942_s22, 0 }
   0xa   : > { %p150_p2 = scmp.lt.s32.totalorder %s887_s18, 3  ;;  %s889_s24 = smov [#allocation5]  }
   0xb   : > { %s163_s25 = sshll.u32 %s889_s24, 4  ;;  %s890_s26 = smov 64   ;;  %s164_s25 = int_to_ptr.vmem [resolvable:$true] %s163_s25 }
   0xc   : > { %p947_p3 = pnand %p560_p0, %p150_p2  ;;  %s891_s27 = smov 4  }
   0xd   : > { %s559_s28 = sadd.s32 4294967294, %s887_s18   ;;  %s958_s29 = sadd.s32 1, %s887_s18  }
   0xe   : > { %p669_p4 = pneg %p947_p3  ;;  %s32_s30 = sadd.s32 1, %s883_s17 }
   0xf   : > { %s29_s5 = ssub.s32 %s887_s18, %s958_s29  ;;  %p39_p7 = scmp.ne.s32.totalorder %s883_s17, %s879_s16 }
  0x10   : > { %p670_p6 = pnand %p669_p4, %p46_p1  ;;  %p30_p8 = scmp.eq.s32.totalorder %s29_s5, 0 }
  0x11   : > { %p40_p9 = scmp.eq.s32.totalorder %s887_s18, 0  ;;  %p45_p10 = scmp.ne.s32.totalorder %s879_s16, %s875_s15 }
  0x12   : > { %672 = dma.hbm_to_vmem [thread:$0]  (!%p670_p6), %s162_s21, 2048, %s164_s25, [#allocation6], %s890_s26, %s890_s26, %s891_s27  }
  0x13   : > { %p111_p11 = scmp.eq.s32.totalorder %s942_s22, 1  ;;  %p974_p12 = por %p46_p1, %p45_p10 }
  0x14   : > { %s970_s6 = scalar_select %p30_p8, %s883_s17, %s32_s30  }
  0x15   : > { %p978_p13 = por %p111_p11, %p39_p7  ;;  %p117_p0 = scmp.eq.s32.totalorder %s559_s28, 1 }
  0x16   : > { %p41_p2 = por %p40_p9, %p39_p7  ;;  %s180_s9 = sand.u32 1, %s883_s17  }
  0x17   : > { %p983_p4 = por %p117_p0, %p45_p10  ;;  %p685_p6 = scmp.lt.s32.totalorder %s887_s18, 2 }
  0x18   : > { %s563_s11 = sshll.u32 %s180_s9, 4  ;;  %s642_s12 = sshll.u32 %s887_s18, 4 }
  0x19   : > { %s189_s19 = scalar_lea.hbm %s1083_s0, %s642_s12  ;;  %s184_s21 = scalar_lea.vmem [#allocation2], %s563_s11 }
  0x1a   : > { %s191_s20 = sshll.u32 %s189_s19, 4  ;;  %s193_s24 = sshll.u32 %s184_s21, 4  ;;  %s192_s20 = int_to_ptr.hbm [resolvable:$true] %s191_s20  ;;  %s194_s24 = int_to_ptr.vmem [resolvable:$true] %s193_s24 }
  0x1b   : > { %p992_p8 = pnand %p685_p6, %p41_p2  ;;  %s181_s26 = scalar_lea.sflag [#allocation3], %s180_s9 }
  0x1c   : > { %s755_s27 = sshra.s32 %s192_s20, 4  ;;  %s762_s11 = scalar_lea.hbm %s1083_s0, 32  ;;  %s756_s27 = int_to_ptr.hbm [resolvable:$true] %s755_s27 }
  0x1d   : > { %s757_s28 = scalar_lea.hbm %s756_s27, 16  ;;  %p759_p9 = pneg %p992_p8 }
  0x1e   : > { %p758_p7 = scmp.ne.s32.totalorder %s756_s27, %s757_s28  ;;  %p763_p0 = scmp.lt.s32.totalorder %s756_s27, %s1083_s0 }
  0x1f   : > { %p764_p2 = scmp.lt.s32.totalorder %s762_s11, %s757_s28 }
  0x20   : > { %p760_p10 = pnand %p759_p9, %p758_p7 }
  0x21   : > { %p765_p6 = por %p764_p2, %p763_p0 }
  0x22   : > { %p761_p11 = pneg %p760_p10 }
  0x24   : > { %p766_p5 = pnand %p765_p6, %p761_p11 }
  0x26   : > { %769 = shalt.err (!%p766_p5)
}
  0x27   : > { %676 = dma.hbm_to_vmem [thread:$0]  (!%p992_p8), %s192_s20, 256, %s194_s24, %s181_s26  }
  0x28   : > { %202 = sbr.rel (%p947_p3) target bundleno = 225 (0xe1), region = 32  ;;  %s1009_s9 = sand.u32 (!%p947_p3), 1, %s879_s16  }
  0x29   : > { %s567_s14 = sshll.u32 (!%p947_p3), %s1009_s9, 4  ;;  %s205_s19 = scalar_lea.sflag (!%p947_p3), [#allocation3], %s1009_s9 }
  0x2a   : > { %s1013_s21 = scalar_lea.vmem (!%p947_p3), [#allocation2], %s567_s14 }
  0x2d   : > { %858 = dma.done.wait (%p974_p12), %s205_s19, 256  }
  0x2e   : > { %860 = vsyncadd (%p974_p12), %s205_s19, 4294967040 }
  0x2f   : > { %862 = dma.done.wait (%p46_p1), [#allocation6], 2048  }
  0x30   : > { %864 = vsyncadd (%p46_p1), [#allocation6], 4294965248  ;;  %v650_v0 = vld [vmem:[#allocation5 + $0x38] sm:$0xff]  ;;  %v649_v2 = vld [vmem:[#allocation5 + $0x30] sm:$0xff]  ;;  %s638_s23 = sshll.u32 %s942_s22, 3  ;;  %s569_s7 = sshll.u32 %s1009_s9, 3 }
  0x31   : > { %v658_v1 = vld [vmem:[#allocation5 + $0x78] sm:$0xff]  ;;  %376 = vmatpush.bf16.msra.mxu0 %v650_v0  ;;  %v657_v3 = vld [vmem:[#allocation5 + $0x70] sm:$0xff]  ;;  %v648_v4 = vld [vmem:[#allocation5 + $0x28] sm:$0xff]  ;;  %s427_s25 = scalar_lea.hbm %s1086_s3, %s638_s23  ;;  %s441_s28 = scalar_lea.hbm %s1087_s4, %s638_s23  ;;  %v892_v24 = vmov 0.0  }
  0x32   : > { %389 = vmatpush.bf16.msra.mxu1 %v658_v1  ;;  %v656_v5 = vld [vmem:[#allocation5 + $0x68] sm:$0xff]  ;;  %v647_v6 = vld [vmem:[#allocation5 + $0x20] sm:$0xff]  ;;  %v646_v8 = vld [vmem:[#allocation5 + $0x18] sm:$0xff]  ;;  %s236_s30 = scalar_lea.vmem [#allocation7], %s569_s7  ;;  %s431_s11 = sshll.u32 %s427_s25, 4  ;;  %s432_s11 = int_to_ptr.hbm [resolvable:$true] %s431_s11 }
  0x33   : > { %v655_v7 = vld [vmem:[#allocation5 + $0x60] sm:$0xff]  ;;  %v654_v9 = vld [vmem:[#allocation5 + $0x58] sm:$0xff]  ;;  %v645_v10 = vld [vmem:[#allocation5 + $0x10] sm:$0xff]  ;;  %s429_s5 = sshll.u32 %s236_s30, 4  ;;  %s243_s22 = scalar_lea.vmem [#allocation8], %s569_s7  ;;  %s430_s5 = int_to_ptr.vmem [resolvable:$true] %s429_s5 }
  0x34   : > { %v653_v11 = vld [vmem:[#allocation5 + $0x50] sm:$0xff]  ;;  %v644_v12 = vld [vmem:[#allocation5 + $0x8] sm:$0xff]  ;;  %v643_v14 = vld [vmem:[#allocation5] sm:$0xff]  ;;  %s443_s14 = sshll.u32 %s243_s22, 4  ;;  %s445_s19 = sshll.u32 %s441_s28, 4  ;;  %s1036_s14 = int_to_ptr.vmem [resolvable:$true] %s443_s14  ;;  %s1038_s19 = int_to_ptr.hbm [resolvable:$true] %s445_s19 }
  0x35   : > { %377 = vmatpush.bf16.msra.mxu0 %v649_v2  ;;  %v652_v13 = vld [vmem:[#allocation5 + $0x48] sm:$0xff]  ;;  %v651_v15 = vld [vmem:[#allocation5 + $0x40] sm:$0xff]  ;;  %s799_s23 = sshra.s32 %s432_s11, 4  ;;  %s805_s25 = scalar_lea.hbm %s1086_s3, 16  ;;  %s800_s23 = int_to_ptr.hbm [resolvable:$true] %s799_s23 }
  0x36   : > { %390 = vmatpush.bf16.msra.mxu1 %v657_v3  ;;  %v244_v16 = vld [vmem:[%s1013_s21] sm:$0xff]  ;;  %v245_v17 = vld [vmem:[%s1013_s21 + $0x8] sm:$0xff]  ;;  %s412_s21 = scalar_lea.sflag [#allocation4], %s1009_s9  ;;  %s801_s20 = scalar_lea.hbm %s800_s23, 8 }
  0x37   : > { %v246_v18 = vpack.c.bf16 %v244_v16, %v244_v16  ;;  %v247_v19 = vpack.c.bf16 %v245_v17, %v245_v17  ;;  %v724_v20 = vld [vmem:[%s1085_s2] ss:$0 sm:$0xff]  ;;  %p802_p1 = scmp.ne.s32.totalorder %s800_s23, %s801_s20  ;;  %p806_p12 = scmp.lt.s32.totalorder %s800_s23, %s1086_s3 }
  0x38   : > { %p807_p8 = scmp.lt.s32.totalorder %s805_s25, %s801_s20 }
  0x39   : > { %378 = vmatpush.bf16.msra.mxu0 %v648_v4  ;;  %p803_p3 = pnand %p802_p1, %p978_p13 }
  0x3a   : > { %391 = vmatpush.bf16.msra.mxu1 %v656_v5  ;;  %p808_p7 = por %p807_p8, %p806_p12 }
  0x3b   : > { %p804_p5 = pneg %p803_p3 }
  0x3d   : > { %379 = vmatpush.bf16.msra.mxu0 %v647_v6  ;;  %p809_p9 = pnand %p808_p7, %p804_p5 }
  0x3e   : > { %392 = vmatpush.bf16.msra.mxu1 %v655_v7 }
  0x41   : > { %380 = vmatpush.bf16.msra.mxu0 %v646_v8 }
  0x42   : > { %393 = vmatpush.bf16.msra.mxu1 %v654_v9 }
  0x45   : > { %381 = vmatpush.bf16.msra.mxu0 %v645_v10 }
  0x46   : > { %394 = vmatpush.bf16.msra.mxu1 %v653_v11 }
  0x49   : > { %382 = vmatpush.bf16.msra.mxu0 %v644_v12 }
  0x4a   : > { %395 = vmatpush.bf16.msra.mxu1 %v652_v13 }
  0x4d   : > { %383 = vmatpush.bf16.msra.mxu0 %v643_v14 }
  0x4e   : > { %396 = vmatpush.bf16.msra.mxu1 %v651_v15 }
  0x50   : > { %384 = vmatmul.bf16.vlgmr.msra.gmra.mxu0 %v246_v18 }
  0x51   : > { %397 = vmatmul.bf16.vlgmr.msra.gmra.mxu1 %v247_v19 }
  0xcd   : > { %v385_v21 = vpop.f32.mrf.mxu0 }
  0xce   : > { %v398_v22 = vpop.f32.mrf.mxu1 }
  0xcf   : > { %v399_v23 = vadd.f32 %v398_v22, %v385_v21 }
  0xd1   : > { %402 = vst [vmem:[%s236_s30] sm:$0xff] %v399_v23  ;;  %vm407_vm0 = vcmp.ge.f32.partialorder %v399_v23, %v724_v20 }
  0xd2   : > { %v635_v25 = vsel %vm407_vm0, 1.0, %v892_v24 }
  0xd3   : > { %812 = shalt.err (!%p809_p9)
}
  0xd4   : > { %665 = dma.vmem_to_hbm [thread:$0]  (%p978_p13), %s430_s5, 128, %s432_s11, %s412_s21   ;;  %410 = vst [vmem:[%s243_s22] sm:$0xff] %v635_v25 }
  0xd5   : > { %s417_s28 = scalar_lea.sflag [#allocation9], %s1009_s9  ;;  %s827_s30 = sshra.s32 %s1038_s19, 4  ;;  %s828_s30 = int_to_ptr.hbm [resolvable:$true] %s827_s30 }
  0xd6   : > { %s829_s12 = scalar_lea.hbm %s828_s30, 8  ;;  %s833_s20 = scalar_lea.hbm %s1087_s4, 16 }
  0xd7   : > { %p830_p10 = scmp.ne.s32.totalorder %s828_s30, %s829_s12  ;;  %p834_p2 = scmp.lt.s32.totalorder %s828_s30, %s1087_s4 }
  0xd8   : > { %p835_p6 = scmp.lt.s32.totalorder %s833_s20, %s829_s12 }
  0xd9   : > { %p831_p11 = pnand %p830_p10, %p978_p13 }
  0xda   : > { %p836_p1 = por %p835_p6, %p834_p2 }
  0xdb   : > { %p832_p0 = pneg %p831_p11 }
  0xdd   : > { %p837_p3 = pnand %p836_p1, %p832_p0 }
  0xdf   : > { %840 = shalt.err (!%p837_p3)
}
  0xe0   : > { %666 = dma.vmem_to_hbm [thread:$0]  (%p978_p13), %s1036_s14, 128, %s1038_s19, %s417_s28   ;;  %v387_v26 = vpop.f32.mrf.mxu0  ;;  %v400_v27 = vpop.f32.mrf.mxu1 }
  0xe1 PF: > { %s457_s9 = sand.u32 1, %s875_s15   ;;  %p1093_p5 = scmp.ge.s32.totalorder %s887_s18, 2 }
  0xe2   : > { %s458_s5 = scalar_lea.sflag [#allocation4], %s457_s9 }
  0xe3   : > { %p678_p12 = pnand %p1093_p5, %p983_p4 }
  0xe5   : > { %p679_p8 = pneg %p678_p12 }
  0xe7   : > { %866 = dma.done.wait (%p679_p8), %s458_s5, 128  }
  0xe8   : > { %868 = vsyncadd (%p679_p8), %s458_s5, 4294967168  ;;  %s468_s11 = scalar_lea.sflag [#allocation9], %s457_s9 }
  0xe9   : > { %870 = dma.done.wait (%p679_p8), %s468_s11, 128  }
  0xea   : > { %872 = vsyncadd (%p679_p8), %s468_s11, 4294967168  ;;  %p22_p13 = scmp.ge.s32.totalorder %s958_s29, 4   ;;  %s1094_s15 = smov %s879_s16 }
  0xeb   : > { %s1095_s16 = smov %s883_s17  ;;  %s1096_s17 = smov %s970_s6 }
  0xec   : > { %s1097_s18 = smov %s958_s29  ;;  %24 = sbr.rel (!%p22_p13) target bundleno = 8 (0x8), region = 98 }
  0xf1   :  { %474 = vsyncpa [#allocation3], 1 }
  0xf2   :  { %476 = vsyncpa [#allocation3 + $0x1], 1 }
  0xf3   :  { %477 = vsyncpa [#allocation6], 1 }
  0xf4   :  { %478 = vsyncpa [#allocation4], 1 }
  0xf5   :  { %480 = vsyncpa [#allocation4 + $0x1], 1 }
  0xf6   :  { %481 = vsyncpa [#allocation9], 1 }
  0xf7   :  { %483 = vsyncpa [#allocation9 + $0x1], 1 }

</bundles_post_ra>
